<compile_context>
chip_gen: v5e
topology: v5e:2x2
jax: 0.10.0
libtpu: 0.0.40
codegen_flags: <defaults>
</compile_context>

<pallas_src>
import math
from functools import partial

import jax
import jax.numpy as jnp
from jax import lax
from jax.experimental import pallas as pl
from jax.experimental.pallas import tpu as pltpu


# ---- in-kernel special functions ------------------------------------------
# Valid for x >= 1 (holds here: alpha = evidence + 1 >= 1, alp >= 1) and for
# x <~ 1e6 (the 6-term product x(x+1)...(x+5) must stay inside f32 range).
def _digamma_ge1(x):
    # shift = sum_{k=0}^{5} 1/(x+k) folded into a single rational n/d
    # (1 divide instead of 6 reciprocals), then asymptotic series at z = x+6.
    n = jnp.ones_like(x)
    d = x
    for k in range(1, 6):
        t = x + float(k)
        n = n * t + d
        d = d * t
    shift = n / d
    z = x + 6.0
    inv = 1.0 / z
    inv2 = inv * inv
    tail = inv2 * (1.0 / 12.0 - inv2 * (1.0 / 120.0 - inv2 * (1.0 / 252.0)))
    return jnp.log(z) - 0.5 * inv - tail - shift


def _lgamma_ge1(x):
    # shift = sum_{k=0}^{5} log(x+k) = log(prod(x+k)): 1 log instead of 6.
    p = x
    for k in range(1, 6):
        p = p * (x + float(k))
    shift = jnp.log(p)
    z = x + 6.0
    inv = 1.0 / z
    inv2 = inv * inv
    tail = inv * (1.0 / 12.0 - inv2 * (1.0 / 360.0 - inv2 * (1.0 / 1260.0)))
    return (z - 0.5) * jnp.log(z) - z + 0.5 * math.log(2.0 * math.pi) + tail - shift


# ------------------------------- kernel ------------------------------------
def _dirichlet_kernel(gs_ref,                       # scalar prefetch (SMEM)
                      x_ref, w1_ref, b1_ref, w2_ref, b2_ref, y_ref,   # inputs
                      ev_ref, unc_ref, loss_ref,                      # outputs
                      acc_ref,                                        # scratch
                      *, num_classes, lgamma_c, inv_seq, inv_batch, inv_anneal):
    step = pl.program_id(0)

    @pl.when(step == 0)
    def _():
        acc_ref[...] = jnp.zeros_like(acc_ref)

    # Streaming seq-sum of this (B, tS, D) tile into the (B, D) f32 accumulator.
    acc_ref[...] += jnp.sum(x_ref[...], axis=1)

    @pl.when(step == pl.num_programs(0) - 1)
    def _():
        # mean-fold: mean_S(x @ W1 + b1) == mean_S(x) @ W1 + b1
        xm = (acc_ref[...] * inv_seq).astype(jnp.bfloat16)            # (B, D)
        m = jnp.dot(xm, w1_ref[...],
                    preferred_element_type=jnp.float32) + b1_ref[...]  # (B, D) f32
        logits = jnp.dot(m.astype(jnp.bfloat16), w2_ref[...],
                         preferred_element_type=jnp.float32) + b2_ref[...]  # (B, C)

        # PyTorch Softplus (beta=1, threshold=20), log1p formulation
        ev = jnp.where(logits > 20.0, logits,
                       jnp.log1p(jnp.exp(jnp.minimum(logits, 20.0))))
        ev_ref[...] = ev

        alpha = ev + 1.0
        s = jnp.sum(alpha, axis=1, keepdims=True)                     # (B, 1)
        unc_ref[...] = num_classes / s

        y = y_ref[...]                                                # (B, 1) int32
        label = (lax.broadcasted_iota(jnp.int32, ev.shape, 1) == y).astype(jnp.float32)

        # ace loss: digamma(alpha) only needed at the label column.
        alpha_y = jnp.sum(label * alpha, axis=1, keepdims=True)       # (B, 1)
        acl = _digamma_ge1(s) - _digamma_ge1(alpha_y)                 # (B, 1)

        # kl_loss(alp, C) with beta = ones
        alp = ev * (1.0 - label) + 1.0                                # (B, C)
        s_a = jnp.sum(alp, axis=1, keepdims=True)
        log_alpha = _lgamma_ge1(s_a) - jnp.sum(_lgamma_ge1(alp), axis=1, keepdims=True)
        kl = (jnp.sum((alp - 1.0) * (_digamma_ge1(alp) - _digamma_ge1(s_a)),
                      axis=1, keepdims=True) + log_alpha - lgamma_c)  # (B, 1)

        # KL annealing coefficient from the runtime global_step scalar (SMEM),
        # so no recompile per training step.
        g = gs_ref[0]
        anneal = jnp.minimum(1.0, g.astype(jnp.float32) * inv_anneal)

        per_ex = acl + anneal * kl                                    # (B, 1)
        loss_ref[...] = jnp.sum(per_ex, axis=0, keepdims=True) * inv_batch  # (1, 1)


# ------------------------------- wrapper ------------------------------------
def _pick_seq_tile(B, S, D, budget_bytes=8 << 20):
    # largest S-tile (multiple of 8, divides S) whose double-buffered f32 slab
    # fits well under the v7x scoped-VMEM budget; fall back to a single block.
    for t in (1024, 512, 256, 128, 64, 32, 16, 8):
        if S % t == 0 and 2 * B * t * D * 4 <= budget_bytes:
            return t
    return S


def dirichlet_forward(x, y, global_step, params, num_classes, annealing_epoch=1):
    B, S, D = x.shape
    w1, b1, w2, b2 = params
    C = num_classes

    tS = _pick_seq_tile(B, S, D)
    nS = S // tS

    x = x.astype(jnp.float32)
    w1_bf = w1.astype(jnp.bfloat16)
    w2_bf = w2.astype(jnp.bfloat16)
    b1_2 = b1.reshape(1, D).astype(jnp.float32)
    b2_2 = b2.reshape(1, C).astype(jnp.float32)
    y2 = y.astype(jnp.int32).reshape(B, 1)
    gs = jnp.asarray(global_step, jnp.int32).reshape(1)   # runtime SMEM scalar

    kernel = partial(
        _dirichlet_kernel,
        num_classes=float(C),
        lgamma_c=float(math.lgamma(C)),
        inv_seq=1.0 / float(S),
        inv_batch=1.0 / float(B),
        inv_anneal=1.0 / float(annealing_epoch),
    )

    grid_spec = pltpu.PrefetchScalarGridSpec(
        num_scalar_prefetch=1,
        grid=(nS,),
        in_specs=[
            pl.BlockSpec((B, tS, D), lambda s, g: (0, s, 0)),   # x (streamed over S)
            pl.BlockSpec((D, D),     lambda s, g: (0, 0)),      # w1 (bf16)
            pl.BlockSpec((1, D),     lambda s, g: (0, 0)),      # b1
            pl.BlockSpec((D, C),     lambda s, g: (0, 0)),      # w2 (bf16)
            pl.BlockSpec((1, C),     lambda s, g: (0, 0)),      # b2
            pl.BlockSpec((B, 1),     lambda s, g: (0, 0)),      # y
        ],
        out_specs=(
            pl.BlockSpec((B, C), lambda s, g: (0, 0)),          # evidences
            pl.BlockSpec((B, 1), lambda s, g: (0, 0)),          # uncertainties
            pl.BlockSpec((1, 1), lambda s, g: (0, 0)),          # loss
        ),
        scratch_shapes=[pltpu.VMEM((B, D), jnp.float32)],       # seq-sum accumulator
    )

    ev, unc, loss = pl.pallas_call(
        kernel,
        out_shape=(
            jax.ShapeDtypeStruct((B, C), jnp.float32),
            jax.ShapeDtypeStruct((B, 1), jnp.float32),
            jax.ShapeDtypeStruct((1, 1), jnp.float32),
        ),
        grid_spec=grid_spec,
        compiler_params=pltpu.CompilerParams(
            dimension_semantics=("arbitrary",)),   # S axis is a reduction
    )(gs, x, w1_bf, b1_2, w2_bf, b2_2, y2)
    # TODO(synk): for very large B a second, "parallel" batch grid axis (per-
    # block partial losses reduced in the wrapper) would engage both v7x TCs.
    return ev, unc, loss[0, 0]


# ------------------------------ reference -----------------------------------
def _reference(x, y, coeff, params, C):
    # Mirrors the kernel's matmul precision (bf16 operands, f32 accumulation);
    # everything else is f32 with exact scipy special functions.
    from jax.scipy.special import digamma, gammaln
    w1, b1, w2, b2 = params
    xm = x.astype(jnp.float32).mean(axis=1)
    m = jnp.dot(xm.astype(jnp.bfloat16), w1.astype(jnp.bfloat16),
                preferred_element_type=jnp.float32) + b1
    logits = jnp.dot(m.astype(jnp.bfloat16), w2.astype(jnp.bfloat16),
                     preferred_element_type=jnp.float32) + b2
    ev = jnp.where(logits > 20.0, logits,
                   jnp.log1p(jnp.exp(jnp.minimum(logits, 20.0))))
    alpha = ev + 1.0
    s = alpha.sum(1, keepdims=True)
    label = jax.nn.one_hot(y, C, dtype=jnp.float32)
    acl = (label * (digamma(s) - digamma(alpha))).sum(1, keepdims=True)
    alp = (alpha - 1.0) * (1.0 - label) + 1.0
    s_a = alp.sum(1, keepdims=True)
    log_alpha = gammaln(s_a) - gammaln(alp).sum(1, keepdims=True)
    log_beta = -gammaln(jnp.float32(C))
    kl = ((alp - 1.0) * (digamma(alp) - digamma(s_a))).sum(1, keepdims=True) \
         + log_alpha + log_beta
    loss = jnp.mean(acl + coeff * kl)
    return ev, C / s, loss


if __name__ == "__main__":
    B, S, D, C = 2, 8, 32, 4
    global_step, annealing_epoch = 1, 1

    key = jax.random.PRNGKey(0)
    k1, k2, k3, k4, k5, k6 = jax.random.split(key, 6)
    # deterministic synthetic parameters (Linear(D,D) and Linear(D,C))
    w1 = jax.random.normal(k1, (D, D), jnp.float32) / jnp.sqrt(D)
    b1 = jax.random.normal(k2, (D,), jnp.float32) * 0.01
    w2 = jax.random.normal(k3, (D, C), jnp.float32) / jnp.sqrt(D)
    b2 = jax.random.normal(k4, (C,), jnp.float32) * 0.01
    params = (w1, b1, w2, b2)

    x = jax.random.normal(k5, (B, S, D), jnp.float32)
    y = jax.random.randint(k6, (B,), 0, C)

    ev, unc, loss = dirichlet_forward(x, y, global_step, params, C, annealing_epoch)
    jax.block_until_ready((ev, unc, loss))

    # correctness check against pure-JAX reference
    coeff = float(min(1.0, global_step / annealing_epoch))
    ev_r, unc_r, loss_r = _reference(x, y, coeff, params, C)
    import numpy as np
    np.testing.assert_allclose(np.asarray(ev), np.asarray(ev_r), rtol=2e-3, atol=2e-3)
    np.testing.assert_allclose(np.asarray(unc), np.asarray(unc_r), rtol=2e-3, atol=2e-3)
    np.testing.assert_allclose(float(loss), float(loss_r), rtol=2e-3, atol=2e-3)

    print("KERNEL_OK")
</pallas_src>

<mosaic_0001>
module attributes {stable_mosaic.version = 11 : i64} {
  func.func @_dirichlet_kernel(%arg0: i32, %arg1: memref<1xi32, #tpu.memory_space<smem>>, %arg2: memref<2x8x32xf32, #tpu.memory_space<vmem>>, %arg3: memref<32x32xbf16, #tpu.memory_space<vmem>>, %arg4: memref<1x32xf32, #tpu.memory_space<vmem>>, %arg5: memref<32x4xbf16, #tpu.memory_space<vmem>>, %arg6: memref<1x4xf32, #tpu.memory_space<vmem>>, %arg7: memref<2x1xi32, #tpu.memory_space<vmem>>, %arg8: memref<2x4xf32, #tpu.memory_space<vmem>>, %arg9: memref<2x1xf32, #tpu.memory_space<vmem>>, %arg10: memref<1x1xf32, #tpu.memory_space<vmem>>, %arg11: memref<2x32xf32, #tpu.memory_space<vmem>>) attributes {dimension_semantics = [#tpu.dimension_semantics<arbitrary>], iteration_bounds = array<i64: 1>, scalar_prefetch = 1 : i64, scratch_operands = 1 : i64, tpu.core_type = #tpu.core_type<tc>, window_params = [{transform_indices = @transform_0, window_bounds = array<i64: 2, 8, 32>}, {pipeline_mode = #tpu.pipeline_mode<synchronous>, transform_indices = @transform_1, window_bounds = array<i64: 32, 32>}, {pipeline_mode = #tpu.pipeline_mode<synchronous>, transform_indices = @transform_2, window_bounds = array<i64: 1, 32>}, {pipeline_mode = #tpu.pipeline_mode<synchronous>, transform_indices = @transform_3, window_bounds = array<i64: 32, 4>}, {pipeline_mode = #tpu.pipeline_mode<synchronous>, transform_indices = @transform_4, window_bounds = array<i64: 1, 4>}, {pipeline_mode = #tpu.pipeline_mode<synchronous>, transform_indices = @transform_5, window_bounds = array<i64: 2, 1>}, {pipeline_mode = #tpu.pipeline_mode<synchronous>, transform_indices = @transform_6, window_bounds = array<i64: 2, 4>}, {pipeline_mode = #tpu.pipeline_mode<synchronous>, transform_indices = @transform_7, window_bounds = array<i64: 2, 1>}, {pipeline_mode = #tpu.pipeline_mode<synchronous>, transform_indices = @transform_8, window_bounds = array<i64: 1, 1>}]} {
    %c0_i32 = arith.constant 0 : i32
    %0 = arith.cmpi eq, %arg0, %c0_i32 : i32
    %1 = arith.extui %0 : i1 to i32
    %c0_i32_0 = arith.constant 0 : i32
    %2 = arith.cmpi ne, %1, %c0_i32_0 : i32
    scf.if %2 {
      %cst_9 = arith.constant 0.000000e+00 : f32
      %11 = vector.broadcast %cst_9 : f32 to vector<2x32xf32>
      %c0_10 = arith.constant 0 : index
      %c0_11 = arith.constant 0 : index
      %12 = vector.load %arg11[%c0_10, %c0_11] : memref<2x32xf32, #tpu.memory_space<vmem>>, vector<2x32xf32>
      tpu.vector_store %arg11[%c0_10, %c0_11], %11 {strides = array<i32>} : memref<2x32xf32, #tpu.memory_space<vmem>>, vector<2x32xf32>,
    } else {
    }
    %c0 = arith.constant 0 : index
    %c0_1 = arith.constant 0 : index
    %3 = vector.load %arg11[%c0, %c0_1] : memref<2x32xf32, #tpu.memory_space<vmem>>, vector<2x32xf32>
    %c0_2 = arith.constant 0 : index
    %c0_3 = arith.constant 0 : index
    %c0_4 = arith.constant 0 : index
    %4 = vector.load %arg2[%c0_2, %c0_3, %c0_4] : memref<2x8x32xf32, #tpu.memory_space<vmem>>, vector<2x8x32xf32>
    %cst = arith.constant dense<0.000000e+00> : vector<2x32xf32>
    %5 = vector.multi_reduction <add>, %4, %cst [1] : vector<2x8x32xf32> to vector<2x32xf32>
    %6 = arith.addf %3, %5 : vector<2x32xf32>
    %c0_5 = arith.constant 0 : index
    %c0_6 = arith.constant 0 : index
    %7 = vector.load %arg11[%c0_5, %c0_6] : memref<2x32xf32, #tpu.memory_space<vmem>>, vector<2x32xf32>
    tpu.vector_store %arg11[%c0_5, %c0_6], %6 {strides = array<i32>} : memref<2x32xf32, #tpu.memory_space<vmem>>, vector<2x32xf32>,
    %c0_i32_7 = arith.constant 0 : i32
    %8 = arith.cmpi eq, %arg0, %c0_i32_7 : i32
    %9 = arith.extui %8 : i1 to i32
    %c0_i32_8 = arith.constant 0 : i32
    %10 = arith.cmpi ne, %9, %c0_i32_8 : i32
    scf.if %10 {
      %c0_9 = arith.constant 0 : index
      %c0_10 = arith.constant 0 : index
      %11 = vector.load %arg11[%c0_9, %c0_10] : memref<2x32xf32, #tpu.memory_space<vmem>>, vector<2x32xf32>
      %cst_11 = arith.constant 1.250000e-01 : f32
      %12 = vector.broadcast %cst_11 : f32 to vector<2x32xf32>
      %13 = arith.mulf %11, %12 : vector<2x32xf32>
      %14 = arith.truncf %13 : vector<2x32xf32> to vector<2x32xbf16>
      %c0_12 = arith.constant 0 : index
      %c0_13 = arith.constant 0 : index
      %15 = vector.load %arg3[%c0_12, %c0_13] : memref<32x32xbf16, #tpu.memory_space<vmem>>, vector<32x32xbf16>
      %cst_14 = arith.constant dense<0.000000e+00> : vector<2x32xf32>
      %16 = tpu.matmul %14, %15, %cst_14 {dimension_numbers = #tpu.dot_dimension_numbers<[1], [0], [0], [1], [0, 0, 1, 1], [], []>} : vector<2x32xbf16>, vector<32x32xbf16>, vector<2x32xf32> -> vector<2x32xf32>
      %c0_15 = arith.constant 0 : index
      %c0_16 = arith.constant 0 : index
      %17 = vector.load %arg4[%c0_15, %c0_16] : memref<1x32xf32, #tpu.memory_space<vmem>>, vector<1x32xf32>
      %18 = vector.broadcast %17 : vector<1x32xf32> to vector<2x32xf32>
      %19 = arith.addf %16, %18 : vector<2x32xf32>
      %20 = arith.truncf %19 : vector<2x32xf32> to vector<2x32xbf16>
      %c0_17 = arith.constant 0 : index
      %c0_18 = arith.constant 0 : index
      %21 = vector.load %arg5[%c0_17, %c0_18] : memref<32x4xbf16, #tpu.memory_space<vmem>>, vector<32x4xbf16>
      %cst_19 = arith.constant dense<0.000000e+00> : vector<2x4xf32>
      %22 = tpu.matmul %20, %21, %cst_19 {dimension_numbers = #tpu.dot_dimension_numbers<[1], [0], [0], [1], [0, 0, 1, 1], [], []>} : vector<2x32xbf16>, vector<32x4xbf16>, vector<2x4xf32> -> vector<2x4xf32>
      %c0_20 = arith.constant 0 : index
      %c0_21 = arith.constant 0 : index
      %23 = vector.load %arg6[%c0_20, %c0_21] : memref<1x4xf32, #tpu.memory_space<vmem>>, vector<1x4xf32>
      %24 = vector.broadcast %23 : vector<1x4xf32> to vector<2x4xf32>
      %25 = arith.addf %22, %24 : vector<2x4xf32>
      %cst_22 = arith.constant 2.000000e+01 : f32
      %26 = vector.broadcast %cst_22 : f32 to vector<2x4xf32>
      %27 = arith.cmpf ogt, %25, %26 : vector<2x4xf32>
      %cst_23 = arith.constant 2.000000e+01 : f32
      %28 = vector.broadcast %cst_23 : f32 to vector<2x4xf32>
      %29 = arith.minimumf %25, %28 : vector<2x4xf32>
      %30 = math.exp %29 : vector<2x4xf32>
      %31 = math.log1p %30 : vector<2x4xf32>
      %32 = arith.select %27, %25, %31 : vector<2x4xi1>, vector<2x4xf32>
      %c0_24 = arith.constant 0 : index
      %c0_25 = arith.constant 0 : index
      %33 = vector.load %arg8[%c0_24, %c0_25] : memref<2x4xf32, #tpu.memory_space<vmem>>, vector<2x4xf32>
      tpu.vector_store %arg8[%c0_24, %c0_25], %32 {strides = array<i32>} : memref<2x4xf32, #tpu.memory_space<vmem>>, vector<2x4xf32>,
      %cst_26 = arith.constant 1.000000e+00 : f32
      %34 = vector.broadcast %cst_26 : f32 to vector<2x4xf32>
      %35 = arith.addf %32, %34 : vector<2x4xf32>
      %cst_27 = arith.constant dense<0.000000e+00> : vector<2xf32>
      %36 = vector.multi_reduction <add>, %35, %cst_27 [1] : vector<2x4xf32> to vector<2xf32>
      %37 = vector.shape_cast %36 : vector<2xf32> to vector<2x1xf32>
      %cst_28 = arith.constant 4.000000e+00 : f32
      %38 = vector.broadcast %cst_28 : f32 to vector<2x1xf32>
      %39 = arith.divf %38, %37 : vector<2x1xf32>
      %c0_29 = arith.constant 0 : index
      %c0_30 = arith.constant 0 : index
      %40 = vector.load %arg9[%c0_29, %c0_30] : memref<2x1xf32, #tpu.memory_space<vmem>>, vector<2x1xf32>
      tpu.vector_store %arg9[%c0_29, %c0_30], %39 {strides = array<i32>} : memref<2x1xf32, #tpu.memory_space<vmem>>, vector<2x1xf32>,
      %c0_31 = arith.constant 0 : index
      %c0_32 = arith.constant 0 : index
      %41 = vector.load %arg7[%c0_31, %c0_32] : memref<2x1xi32, #tpu.memory_space<vmem>>, vector<2x1xi32>
      %42 = tpu.iota {dimensions = array<i32: 1>} : vector<2x4xi32>
      %43 = vector.broadcast %41 : vector<2x1xi32> to vector<2x4xi32>
      %44 = arith.cmpi eq, %42, %43 : vector<2x4xi32>
      %45 = arith.extui %44 : vector<2x4xi1> to vector<2x4xi32>
      %46 = arith.sitofp %45 : vector<2x4xi32> to vector<2x4xf32>
      %47 = arith.mulf %46, %35 : vector<2x4xf32>
      %cst_33 = arith.constant dense<0.000000e+00> : vector<2xf32>
      %48 = vector.multi_reduction <add>, %47, %cst_33 [1] : vector<2x4xf32> to vector<2xf32>
      %49 = vector.shape_cast %48 : vector<2xf32> to vector<2x1xf32>
      %cst_34 = arith.constant 1.000000e+00 : f32
      %50 = vector.broadcast %cst_34 : f32 to vector<2x1xf32>
      %cst_35 = arith.constant 1.000000e+00 : f32
      %51 = vector.broadcast %cst_35 : f32 to vector<2x1xf32>
      %52 = arith.addf %37, %51 : vector<2x1xf32>
      %53 = arith.mulf %50, %52 : vector<2x1xf32>
      %54 = arith.addf %53, %37 : vector<2x1xf32>
      %55 = arith.mulf %37, %52 : vector<2x1xf32>
      %cst_36 = arith.constant 2.000000e+00 : f32
      %56 = vector.broadcast %cst_36 : f32 to vector<2x1xf32>
      %57 = arith.addf %37, %56 : vector<2x1xf32>
      %58 = arith.mulf %54, %57 : vector<2x1xf32>
      %59 = arith.addf %58, %55 : vector<2x1xf32>
      %60 = arith.mulf %55, %57 : vector<2x1xf32>
      %cst_37 = arith.constant 3.000000e+00 : f32
      %61 = vector.broadcast %cst_37 : f32 to vector<2x1xf32>
      %62 = arith.addf %37, %61 : vector<2x1xf32>
      %63 = arith.mulf %59, %62 : vector<2x1xf32>
      %64 = arith.addf %63, %60 : vector<2x1xf32>
      %65 = arith.mulf %60, %62 : vector<2x1xf32>
      %cst_38 = arith.constant 4.000000e+00 : f32
      %66 = vector.broadcast %cst_38 : f32 to vector<2x1xf32>
      %67 = arith.addf %37, %66 : vector<2x1xf32>
      %68 = arith.mulf %64, %67 : vector<2x1xf32>
      %69 = arith.addf %68, %65 : vector<2x1xf32>
      %70 = arith.mulf %65, %67 : vector<2x1xf32>
      %cst_39 = arith.constant 5.000000e+00 : f32
      %71 = vector.broadcast %cst_39 : f32 to vector<2x1xf32>
      %72 = arith.addf %37, %71 : vector<2x1xf32>
      %73 = arith.mulf %69, %72 : vector<2x1xf32>
      %74 = arith.addf %73, %70 : vector<2x1xf32>
      %75 = arith.mulf %70, %72 : vector<2x1xf32>
      %76 = arith.divf %74, %75 : vector<2x1xf32>
      %cst_40 = arith.constant 6.000000e+00 : f32
      %77 = vector.broadcast %cst_40 : f32 to vector<2x1xf32>
      %78 = arith.addf %37, %77 : vector<2x1xf32>
      %cst_41 = arith.constant 1.000000e+00 : f32
      %79 = vector.broadcast %cst_41 : f32 to vector<2x1xf32>
      %80 = arith.divf %79, %78 : vector<2x1xf32>
      %81 = arith.mulf %80, %80 : vector<2x1xf32>
      %cst_42 = arith.constant 0.0039682542 : f32
      %82 = vector.broadcast %cst_42 : f32 to vector<2x1xf32>
      %83 = arith.mulf %81, %82 : vector<2x1xf32>
      %cst_43 = arith.constant 0.00833333377 : f32
      %84 = vector.broadcast %cst_43 : f32 to vector<2x1xf32>
      %85 = arith.subf %84, %83 : vector<2x1xf32>
      %86 = arith.mulf %81, %85 : vector<2x1xf32>
      %cst_44 = arith.constant 0.0833333358 : f32
      %87 = vector.broadcast %cst_44 : f32 to vector<2x1xf32>
      %88 = arith.subf %87, %86 : vector<2x1xf32>
      %89 = arith.mulf %81, %88 : vector<2x1xf32>
      %90 = math.log %78 : vector<2x1xf32>
      %cst_45 = arith.constant 5.000000e-01 : f32
      %91 = vector.broadcast %cst_45 : f32 to vector<2x1xf32>
      %92 = arith.mulf %91, %80 : vector<2x1xf32>
      %93 = arith.subf %90, %92 : vector<2x1xf32>
      %94 = arith.subf %93, %89 : vector<2x1xf32>
      %95 = arith.subf %94, %76 : vector<2x1xf32>
      %cst_46 = arith.constant 1.000000e+00 : f32
      %96 = vector.broadcast %cst_46 : f32 to vector<2x1xf32>
      %cst_47 = arith.constant 1.000000e+00 : f32
      %97 = vector.broadcast %cst_47 : f32 to vector<2x1xf32>
      %98 = arith.addf %49, %97 : vector<2x1xf32>
      %99 = arith.mulf %96, %98 : vector<2x1xf32>
      %100 = arith.addf %99, %49 : vector<2x1xf32>
      %101 = arith.mulf %49, %98 : vector<2x1xf32>
      %cst_48 = arith.constant 2.000000e+00 : f32
      %102 = vector.broadcast %cst_48 : f32 to vector<2x1xf32>
      %103 = arith.addf %49, %102 : vector<2x1xf32>
      %104 = arith.mulf %100, %103 : vector<2x1xf32>
      %105 = arith.addf %104, %101 : vector<2x1xf32>
      %106 = arith.mulf %101, %103 : vector<2x1xf32>
      %cst_49 = arith.constant 3.000000e+00 : f32
      %107 = vector.broadcast %cst_49 : f32 to vector<2x1xf32>
      %108 = arith.addf %49, %107 : vector<2x1xf32>
      %109 = arith.mulf %105, %108 : vector<2x1xf32>
      %110 = arith.addf %109, %106 : vector<2x1xf32>
      %111 = arith.mulf %106, %108 : vector<2x1xf32>
      %cst_50 = arith.constant 4.000000e+00 : f32
      %112 = vector.broadcast %cst_50 : f32 to vector<2x1xf32>
      %113 = arith.addf %49, %112 : vector<2x1xf32>
      %114 = arith.mulf %110, %113 : vector<2x1xf32>
      %115 = arith.addf %114, %111 : vector<2x1xf32>
      %116 = arith.mulf %111, %113 : vector<2x1xf32>
      %cst_51 = arith.constant 5.000000e+00 : f32
      %117 = vector.broadcast %cst_51 : f32 to vector<2x1xf32>
      %118 = arith.addf %49, %117 : vector<2x1xf32>
      %119 = arith.mulf %115, %118 : vector<2x1xf32>
      %120 = arith.addf %119, %116 : vector<2x1xf32>
      %121 = arith.mulf %116, %118 : vector<2x1xf32>
      %122 = arith.divf %120, %121 : vector<2x1xf32>
      %cst_52 = arith.constant 6.000000e+00 : f32
      %123 = vector.broadcast %cst_52 : f32 to vector<2x1xf32>
      %124 = arith.addf %49, %123 : vector<2x1xf32>
      %cst_53 = arith.constant 1.000000e+00 : f32
      %125 = vector.broadcast %cst_53 : f32 to vector<2x1xf32>
      %126 = arith.divf %125, %124 : vector<2x1xf32>
      %127 = arith.mulf %126, %126 : vector<2x1xf32>
      %cst_54 = arith.constant 0.0039682542 : f32
      %128 = vector.broadcast %cst_54 : f32 to vector<2x1xf32>
      %129 = arith.mulf %127, %128 : vector<2x1xf32>
      %cst_55 = arith.constant 0.00833333377 : f32
      %130 = vector.broadcast %cst_55 : f32 to vector<2x1xf32>
      %131 = arith.subf %130, %129 : vector<2x1xf32>
      %132 = arith.mulf %127, %131 : vector<2x1xf32>
      %cst_56 = arith.constant 0.0833333358 : f32
      %133 = vector.broadcast %cst_56 : f32 to vector<2x1xf32>
      %134 = arith.subf %133, %132 : vector<2x1xf32>
      %135 = arith.mulf %127, %134 : vector<2x1xf32>
      %136 = math.log %124 : vector<2x1xf32>
      %cst_57 = arith.constant 5.000000e-01 : f32
      %137 = vector.broadcast %cst_57 : f32 to vector<2x1xf32>
      %138 = arith.mulf %137, %126 : vector<2x1xf32>
      %139 = arith.subf %136, %138 : vector<2x1xf32>
      %140 = arith.subf %139, %135 : vector<2x1xf32>
      %141 = arith.subf %140, %122 : vector<2x1xf32>
      %142 = arith.subf %95, %141 : vector<2x1xf32>
      %cst_58 = arith.constant 1.000000e+00 : f32
      %143 = vector.broadcast %cst_58 : f32 to vector<2x4xf32>
      %144 = arith.subf %143, %46 : vector<2x4xf32>
      %145 = arith.mulf %32, %144 : vector<2x4xf32>
      %cst_59 = arith.constant 1.000000e+00 : f32
      %146 = vector.broadcast %cst_59 : f32 to vector<2x4xf32>
      %147 = arith.addf %145, %146 : vector<2x4xf32>
      %cst_60 = arith.constant dense<0.000000e+00> : vector<2xf32>
      %148 = vector.multi_reduction <add>, %147, %cst_60 [1] : vector<2x4xf32> to vector<2xf32>
      %149 = vector.shape_cast %148 : vector<2xf32> to vector<2x1xf32>
      %cst_61 = arith.constant 1.000000e+00 : f32
      %150 = vector.broadcast %cst_61 : f32 to vector<2x1xf32>
      %151 = arith.addf %149, %150 : vector<2x1xf32>
      %152 = arith.mulf %149, %151 : vector<2x1xf32>
      %cst_62 = arith.constant 2.000000e+00 : f32
      %153 = vector.broadcast %cst_62 : f32 to vector<2x1xf32>
      %154 = arith.addf %149, %153 : vector<2x1xf32>
      %155 = arith.mulf %152, %154 : vector<2x1xf32>
      %cst_63 = arith.constant 3.000000e+00 : f32
      %156 = vector.broadcast %cst_63 : f32 to vector<2x1xf32>
      %157 = arith.addf %149, %156 : vector<2x1xf32>
      %158 = arith.mulf %155, %157 : vector<2x1xf32>
      %cst_64 = arith.constant 4.000000e+00 : f32
      %159 = vector.broadcast %cst_64 : f32 to vector<2x1xf32>
      %160 = arith.addf %149, %159 : vector<2x1xf32>
      %161 = arith.mulf %158, %160 : vector<2x1xf32>
      %cst_65 = arith.constant 5.000000e+00 : f32
      %162 = vector.broadcast %cst_65 : f32 to vector<2x1xf32>
      %163 = arith.addf %149, %162 : vector<2x1xf32>
      %164 = arith.mulf %161, %163 : vector<2x1xf32>
      %165 = math.log %164 : vector<2x1xf32>
      %cst_66 = arith.constant 6.000000e+00 : f32
      %166 = vector.broadcast %cst_66 : f32 to vector<2x1xf32>
      %167 = arith.addf %149, %166 : vector<2x1xf32>
      %cst_67 = arith.constant 1.000000e+00 : f32
      %168 = vector.broadcast %cst_67 : f32 to vector<2x1xf32>
      %169 = arith.divf %168, %167 : vector<2x1xf32>
      %170 = arith.mulf %169, %169 : vector<2x1xf32>
      %cst_68 = arith.constant 7.93650805E-4 : f32
      %171 = vector.broadcast %cst_68 : f32 to vector<2x1xf32>
      %172 = arith.mulf %170, %171 : vector<2x1xf32>
      %cst_69 = arith.constant 0.00277777785 : f32
      %173 = vector.broadcast %cst_69 : f32 to vector<2x1xf32>
      %174 = arith.subf %173, %172 : vector<2x1xf32>
      %175 = arith.mulf %170, %174 : vector<2x1xf32>
      %cst_70 = arith.constant 0.0833333358 : f32
      %176 = vector.broadcast %cst_70 : f32 to vector<2x1xf32>
      %177 = arith.subf %176, %175 : vector<2x1xf32>
      %178 = arith.mulf %169, %177 : vector<2x1xf32>
      %cst_71 = arith.constant 5.000000e-01 : f32
      %179 = vector.broadcast %cst_71 : f32 to vector<2x1xf32>
      %180 = arith.subf %167, %179 : vector<2x1xf32>
      %181 = math.log %167 : vector<2x1xf32>
      %182 = arith.mulf %180, %181 : vector<2x1xf32>
      %183 = arith.subf %182, %167 : vector<2x1xf32>
      %cst_72 = arith.constant 0.918938517 : f32
      %184 = vector.broadcast %cst_72 : f32 to vector<2x1xf32>
      %185 = arith.addf %183, %184 : vector<2x1xf32>
      %186 = arith.addf %185, %178 : vector<2x1xf32>
      %187 = arith.subf %186, %165 : vector<2x1xf32>
      %cst_73 = arith.constant 1.000000e+00 : f32
      %188 = vector.broadcast %cst_73 : f32 to vector<2x4xf32>
      %189 = arith.addf %147, %188 : vector<2x4xf32>
      %190 = arith.mulf %147, %189 : vector<2x4xf32>
      %cst_74 = arith.constant 2.000000e+00 : f32
      %191 = vector.broadcast %cst_74 : f32 to vector<2x4xf32>
      %192 = arith.addf %147, %191 : vector<2x4xf32>
      %193 = arith.mulf %190, %192 : vector<2x4xf32>
      %cst_75 = arith.constant 3.000000e+00 : f32
      %194 = vector.broadcast %cst_75 : f32 to vector<2x4xf32>
      %195 = arith.addf %147, %194 : vector<2x4xf32>
      %196 = arith.mulf %193, %195 : vector<2x4xf32>
      %cst_76 = arith.constant 4.000000e+00 : f32
      %197 = vector.broadcast %cst_76 : f32 to vector<2x4xf32>
      %198 = arith.addf %147, %197 : vector<2x4xf32>
      %199 = arith.mulf %196, %198 : vector<2x4xf32>
      %cst_77 = arith.constant 5.000000e+00 : f32
      %200 = vector.broadcast %cst_77 : f32 to vector<2x4xf32>
      %201 = arith.addf %147, %200 : vector<2x4xf32>
      %202 = arith.mulf %199, %201 : vector<2x4xf32>
      %203 = math.log %202 : vector<2x4xf32>
      %cst_78 = arith.constant 6.000000e+00 : f32
      %204 = vector.broadcast %cst_78 : f32 to vector<2x4xf32>
      %205 = arith.addf %147, %204 : vector<2x4xf32>
      %cst_79 = arith.constant 1.000000e+00 : f32
      %206 = vector.broadcast %cst_79 : f32 to vector<2x4xf32>
      %207 = arith.divf %206, %205 : vector<2x4xf32>
      %208 = arith.mulf %207, %207 : vector<2x4xf32>
      %cst_80 = arith.constant 7.93650805E-4 : f32
      %209 = vector.broadcast %cst_80 : f32 to vector<2x4xf32>
      %210 = arith.mulf %208, %209 : vector<2x4xf32>
      %cst_81 = arith.constant 0.00277777785 : f32
      %211 = vector.broadcast %cst_81 : f32 to vector<2x4xf32>
      %212 = arith.subf %211, %210 : vector<2x4xf32>
      %213 = arith.mulf %208, %212 : vector<2x4xf32>
      %cst_82 = arith.constant 0.0833333358 : f32
      %214 = vector.broadcast %cst_82 : f32 to vector<2x4xf32>
      %215 = arith.subf %214, %213 : vector<2x4xf32>
      %216 = arith.mulf %207, %215 : vector<2x4xf32>
      %cst_83 = arith.constant 5.000000e-01 : f32
      %217 = vector.broadcast %cst_83 : f32 to vector<2x4xf32>
      %218 = arith.subf %205, %217 : vector<2x4xf32>
      %219 = math.log %205 : vector<2x4xf32>
      %220 = arith.mulf %218, %219 : vector<2x4xf32>
      %221 = arith.subf %220, %205 : vector<2x4xf32>
      %cst_84 = arith.constant 0.918938517 : f32
      %222 = vector.broadcast %cst_84 : f32 to vector<2x4xf32>
      %223 = arith.addf %221, %222 : vector<2x4xf32>
      %224 = arith.addf %223, %216 : vector<2x4xf32>
      %225 = arith.subf %224, %203 : vector<2x4xf32>
      %cst_85 = arith.constant dense<0.000000e+00> : vector<2xf32>
      %226 = vector.multi_reduction <add>, %225, %cst_85 [1] : vector<2x4xf32> to vector<2xf32>
      %227 = vector.shape_cast %226 : vector<2xf32> to vector<2x1xf32>
      %228 = arith.subf %187, %227 : vector<2x1xf32>
      %cst_86 = arith.constant 1.000000e+00 : f32
      %229 = vector.broadcast %cst_86 : f32 to vector<2x4xf32>
      %230 = arith.subf %147, %229 : vector<2x4xf32>
      %cst_87 = arith.constant 1.000000e+00 : f32
      %231 = vector.broadcast %cst_87 : f32 to vector<2x4xf32>
      %cst_88 = arith.constant 1.000000e+00 : f32
      %232 = vector.broadcast %cst_88 : f32 to vector<2x4xf32>
      %233 = arith.addf %147, %232 : vector<2x4xf32>
      %234 = arith.mulf %231, %233 : vector<2x4xf32>
      %235 = arith.addf %234, %147 : vector<2x4xf32>
      %236 = arith.mulf %147, %233 : vector<2x4xf32>
      %cst_89 = arith.constant 2.000000e+00 : f32
      %237 = vector.broadcast %cst_89 : f32 to vector<2x4xf32>
      %238 = arith.addf %147, %237 : vector<2x4xf32>
      %239 = arith.mulf %235, %238 : vector<2x4xf32>
      %240 = arith.addf %239, %236 : vector<2x4xf32>
      %241 = arith.mulf %236, %238 : vector<2x4xf32>
      %cst_90 = arith.constant 3.000000e+00 : f32
      %242 = vector.broadcast %cst_90 : f32 to vector<2x4xf32>
      %243 = arith.addf %147, %242 : vector<2x4xf32>
      %244 = arith.mulf %240, %243 : vector<2x4xf32>
      %245 = arith.addf %244, %241 : vector<2x4xf32>
      %246 = arith.mulf %241, %243 : vector<2x4xf32>
      %cst_91 = arith.constant 4.000000e+00 : f32
      %247 = vector.broadcast %cst_91 : f32 to vector<2x4xf32>
      %248 = arith.addf %147, %247 : vector<2x4xf32>
      %249 = arith.mulf %245, %248 : vector<2x4xf32>
      %250 = arith.addf %249, %246 : vector<2x4xf32>
      %251 = arith.mulf %246, %248 : vector<2x4xf32>
      %cst_92 = arith.constant 5.000000e+00 : f32
      %252 = vector.broadcast %cst_92 : f32 to vector<2x4xf32>
      %253 = arith.addf %147, %252 : vector<2x4xf32>
      %254 = arith.mulf %250, %253 : vector<2x4xf32>
      %255 = arith.addf %254, %251 : vector<2x4xf32>
      %256 = arith.mulf %251, %253 : vector<2x4xf32>
      %257 = arith.divf %255, %256 : vector<2x4xf32>
      %cst_93 = arith.constant 6.000000e+00 : f32
      %258 = vector.broadcast %cst_93 : f32 to vector<2x4xf32>
      %259 = arith.addf %147, %258 : vector<2x4xf32>
      %cst_94 = arith.constant 1.000000e+00 : f32
      %260 = vector.broadcast %cst_94 : f32 to vector<2x4xf32>
      %261 = arith.divf %260, %259 : vector<2x4xf32>
      %262 = arith.mulf %261, %261 : vector<2x4xf32>
      %cst_95 = arith.constant 0.0039682542 : f32
      %263 = vector.broadcast %cst_95 : f32 to vector<2x4xf32>
      %264 = arith.mulf %262, %263 : vector<2x4xf32>
      %cst_96 = arith.constant 0.00833333377 : f32
      %265 = vector.broadcast %cst_96 : f32 to vector<2x4xf32>
      %266 = arith.subf %265, %264 : vector<2x4xf32>
      %267 = arith.mulf %262, %266 : vector<2x4xf32>
      %cst_97 = arith.constant 0.0833333358 : f32
      %268 = vector.broadcast %cst_97 : f32 to vector<2x4xf32>
      %269 = arith.subf %268, %267 : vector<2x4xf32>
      %270 = arith.mulf %262, %269 : vector<2x4xf32>
      %271 = math.log %259 : vector<2x4xf32>
      %cst_98 = arith.constant 5.000000e-01 : f32
      %272 = vector.broadcast %cst_98 : f32 to vector<2x4xf32>
      %273 = arith.mulf %272, %261 : vector<2x4xf32>
      %274 = arith.subf %271, %273 : vector<2x4xf32>
      %275 = arith.subf %274, %270 : vector<2x4xf32>
      %276 = arith.subf %275, %257 : vector<2x4xf32>
      %cst_99 = arith.constant 1.000000e+00 : f32
      %277 = vector.broadcast %cst_99 : f32 to vector<2x1xf32>
      %cst_100 = arith.constant 1.000000e+00 : f32
      %278 = vector.broadcast %cst_100 : f32 to vector<2x1xf32>
      %279 = arith.addf %149, %278 : vector<2x1xf32>
      %280 = arith.mulf %277, %279 : vector<2x1xf32>
      %281 = arith.addf %280, %149 : vector<2x1xf32>
      %282 = arith.mulf %149, %279 : vector<2x1xf32>
      %cst_101 = arith.constant 2.000000e+00 : f32
      %283 = vector.broadcast %cst_101 : f32 to vector<2x1xf32>
      %284 = arith.addf %149, %283 : vector<2x1xf32>
      %285 = arith.mulf %281, %284 : vector<2x1xf32>
      %286 = arith.addf %285, %282 : vector<2x1xf32>
      %287 = arith.mulf %282, %284 : vector<2x1xf32>
      %cst_102 = arith.constant 3.000000e+00 : f32
      %288 = vector.broadcast %cst_102 : f32 to vector<2x1xf32>
      %289 = arith.addf %149, %288 : vector<2x1xf32>
      %290 = arith.mulf %286, %289 : vector<2x1xf32>
      %291 = arith.addf %290, %287 : vector<2x1xf32>
      %292 = arith.mulf %287, %289 : vector<2x1xf32>
      %cst_103 = arith.constant 4.000000e+00 : f32
      %293 = vector.broadcast %cst_103 : f32 to vector<2x1xf32>
      %294 = arith.addf %149, %293 : vector<2x1xf32>
      %295 = arith.mulf %291, %294 : vector<2x1xf32>
      %296 = arith.addf %295, %292 : vector<2x1xf32>
      %297 = arith.mulf %292, %294 : vector<2x1xf32>
      %cst_104 = arith.constant 5.000000e+00 : f32
      %298 = vector.broadcast %cst_104 : f32 to vector<2x1xf32>
      %299 = arith.addf %149, %298 : vector<2x1xf32>
      %300 = arith.mulf %296, %299 : vector<2x1xf32>
      %301 = arith.addf %300, %297 : vector<2x1xf32>
      %302 = arith.mulf %297, %299 : vector<2x1xf32>
      %303 = arith.divf %301, %302 : vector<2x1xf32>
      %cst_105 = arith.constant 6.000000e+00 : f32
      %304 = vector.broadcast %cst_105 : f32 to vector<2x1xf32>
      %305 = arith.addf %149, %304 : vector<2x1xf32>
      %cst_106 = arith.constant 1.000000e+00 : f32
      %306 = vector.broadcast %cst_106 : f32 to vector<2x1xf32>
      %307 = arith.divf %306, %305 : vector<2x1xf32>
      %308 = arith.mulf %307, %307 : vector<2x1xf32>
      %cst_107 = arith.constant 0.0039682542 : f32
      %309 = vector.broadcast %cst_107 : f32 to vector<2x1xf32>
      %310 = arith.mulf %308, %309 : vector<2x1xf32>
      %cst_108 = arith.constant 0.00833333377 : f32
      %311 = vector.broadcast %cst_108 : f32 to vector<2x1xf32>
      %312 = arith.subf %311, %310 : vector<2x1xf32>
      %313 = arith.mulf %308, %312 : vector<2x1xf32>
      %cst_109 = arith.constant 0.0833333358 : f32
      %314 = vector.broadcast %cst_109 : f32 to vector<2x1xf32>
      %315 = arith.subf %314, %313 : vector<2x1xf32>
      %316 = arith.mulf %308, %315 : vector<2x1xf32>
      %317 = math.log %305 : vector<2x1xf32>
      %cst_110 = arith.constant 5.000000e-01 : f32
      %318 = vector.broadcast %cst_110 : f32 to vector<2x1xf32>
      %319 = arith.mulf %318, %307 : vector<2x1xf32>
      %320 = arith.subf %317, %319 : vector<2x1xf32>
      %321 = arith.subf %320, %316 : vector<2x1xf32>
      %322 = arith.subf %321, %303 : vector<2x1xf32>
      %323 = vector.broadcast %322 : vector<2x1xf32> to vector<2x4xf32>
      %324 = arith.subf %276, %323 : vector<2x4xf32>
      %325 = arith.mulf %230, %324 : vector<2x4xf32>
      %cst_111 = arith.constant dense<0.000000e+00> : vector<2xf32>
      %326 = vector.multi_reduction <add>, %325, %cst_111 [1] : vector<2x4xf32> to vector<2xf32>
      %327 = vector.shape_cast %326 : vector<2xf32> to vector<2x1xf32>
      %328 = arith.addf %327, %228 : vector<2x1xf32>
      %cst_112 = arith.constant 1.79175949 : f32
      %329 = vector.broadcast %cst_112 : f32 to vector<2x1xf32>
      %330 = arith.subf %328, %329 : vector<2x1xf32>
      %c0_113 = arith.constant 0 : index
      %331 = memref.load %arg1[%c0_113] : memref<1xi32, #tpu.memory_space<smem>>
      %332 = arith.sitofp %331 : i32 to f32
      %cst_114 = arith.constant 1.000000e+00 : f32
      %333 = arith.mulf %332, %cst_114 : f32
      %cst_115 = arith.constant 1.000000e+00 : f32
      %334 = arith.minimumf %cst_115, %333 : f32
      %335 = vector.broadcast %334 : f32 to vector<2x1xf32>
      %336 = arith.mulf %335, %330 : vector<2x1xf32>
      %337 = arith.addf %142, %336 : vector<2x1xf32>
      %cst_116 = arith.constant dense<0.000000e+00> : vector<1xf32>
      %338 = vector.multi_reduction <add>, %337, %cst_116 [0] : vector<2x1xf32> to vector<1xf32>
      %339 = vector.shape_cast %338 : vector<1xf32> to vector<1x1xf32>
      %cst_117 = arith.constant 5.000000e-01 : f32
      %340 = vector.broadcast %cst_117 : f32 to vector<1x1xf32>
      %341 = arith.mulf %339, %340 : vector<1x1xf32>
      %c0_118 = arith.constant 0 : index
      %c0_119 = arith.constant 0 : index
      %342 = vector.load %arg10[%c0_118, %c0_119] : memref<1x1xf32, #tpu.memory_space<vmem>>, vector<1x1xf32>
      tpu.vector_store %arg10[%c0_118, %c0_119], %341 {strides = array<i32>} : memref<1x1xf32, #tpu.memory_space<vmem>>, vector<1x1xf32>,
    } else {
    }
    return
  }
  func.func @transform_0(%arg0: i32, %arg1: memref<1xi32, #tpu.memory_space<smem>>) -> (i32, i32, i32) {
    %c0_i32 = arith.constant 0 : i32
    %c0_i32_0 = arith.constant 0 : i32
    %c0_i32_1 = arith.constant 0 : i32
    return %c0_i32, %arg0, %c0_i32_0 : i32, i32, i32
  }
  func.func @transform_1(%arg0: i32, %arg1: memref<1xi32, #tpu.memory_space<smem>>) -> (i32, i32) {
    %c0_i32 = arith.constant 0 : i32
    %c0_i32_0 = arith.constant 0 : i32
    %c0_i32_1 = arith.constant 0 : i32
    return %c0_i32, %c0_i32_0 : i32, i32
  }
  func.func @transform_2(%arg0: i32, %arg1: memref<1xi32, #tpu.memory_space<smem>>) -> (i32, i32) {
    %c0_i32 = arith.constant 0 : i32
    %c0_i32_0 = arith.constant 0 : i32
    %c0_i32_1 = arith.constant 0 : i32
    return %c0_i32, %c0_i32_0 : i32, i32
  }
  func.func @transform_3(%arg0: i32, %arg1: memref<1xi32, #tpu.memory_space<smem>>) -> (i32, i32) {
    %c0_i32 = arith.constant 0 : i32
    %c0_i32_0 = arith.constant 0 : i32
    %c0_i32_1 = arith.constant 0 : i32
    return %c0_i32, %c0_i32_0 : i32, i32
  }
  func.func @transform_4(%arg0: i32, %arg1: memref<1xi32, #tpu.memory_space<smem>>) -> (i32, i32) {
    %c0_i32 = arith.constant 0 : i32
    %c0_i32_0 = arith.constant 0 : i32
    %c0_i32_1 = arith.constant 0 : i32
    return %c0_i32, %c0_i32_0 : i32, i32
  }
  func.func @transform_5(%arg0: i32, %arg1: memref<1xi32, #tpu.memory_space<smem>>) -> (i32, i32) {
    %c0_i32 = arith.constant 0 : i32
    %c0_i32_0 = arith.constant 0 : i32
    %c0_i32_1 = arith.constant 0 : i32
    return %c0_i32, %c0_i32_0 : i32, i32
  }
  func.func @transform_6(%arg0: i32, %arg1: memref<1xi32, #tpu.memory_space<smem>>) -> (i32, i32) {
    %c0_i32 = arith.constant 0 : i32
    %c0_i32_0 = arith.constant 0 : i32
    %c0_i32_1 = arith.constant 0 : i32
    return %c0_i32, %c0_i32_0 : i32, i32
  }
  func.func @transform_7(%arg0: i32, %arg1: memref<1xi32, #tpu.memory_space<smem>>) -> (i32, i32) {
    %c0_i32 = arith.constant 0 : i32
    %c0_i32_0 = arith.constant 0 : i32
    %c0_i32_1 = arith.constant 0 : i32
    return %c0_i32, %c0_i32_0 : i32, i32
  }
  func.func @transform_8(%arg0: i32, %arg1: memref<1xi32, #tpu.memory_space<smem>>) -> (i32, i32) {
    %c0_i32 = arith.constant 0 : i32
    %c0_i32_0 = arith.constant 0 : i32
    %c0_i32_1 = arith.constant 0 : i32
    return %c0_i32, %c0_i32_0 : i32, i32
  }
}

</mosaic_0001>

<bundles_post_ra>
// kernel: tpu_custom_call.1
= control target key start
LH: loop header
LB: loop body
LE: loop exit
PB: predicated region body
PF: predicated region fallthrough
CT: control target
= control target key end

     0   :  { %16 = vsyncpa [#allocation6], 0  ;;  %s943_s0 = inlined_call_operand.<no memory space> [shape: s32[1], index: 0, kind: input, shape index: {}]   ;;  %s944_s1 = inlined_call_operand.vmem [shape: f32[2,8,32], index: 1, kind: input, shape index: {}]   ;;  %s945_s2 = inlined_call_operand.hbm [shape: bf16[32,32], index: 2, kind: input, shape index: {}]   ;;  %s946_s3 = inlined_call_operand.vmem [shape: f32[1,32], index: 3, kind: input, shape index: {}]   ;;  %s947_s4 = inlined_call_operand.vmem [shape: bf16[32,4], index: 4, kind: input, shape index: {}]   ;;  %s948_s5 = inlined_call_operand.vmem [shape: f32[1,4], index: 5, kind: input, shape index: {}]   ;;  %s949_s6 = inlined_call_operand.vmem [shape: s32[2,1], index: 6, kind: input, shape index: {}]   ;;  %s950_s7 = inlined_call_operand.hbm [shape: f32[2,4], index: 7, kind: output, shape index: {0}]   ;;  %s951_s8 = inlined_call_operand.vmem [shape: f32[2,1], index: 8, kind: output, shape index: {1}]   ;;  %s952_s9 = inlined_call_operand.hbm [shape: f32[1,1], index: 9, kind: output, shape index: {2}]  }
   0x1   :  { %17 = vsyncpa [#allocation7], 0 }
   0x2   :  { %18 = vsyncpa [#allocation10], 0  ;;  %s25_s11 = sshll.u32 %s945_s2, 4  ;;  %s705_s12 = smov [#allocation5]   ;;  %s26_s11 = int_to_ptr.hbm [resolvable:$true] %s25_s11 }
   0x3   :  { %s27_s13 = sshll.u32 %s705_s12, 4  ;;  %s706_s14 = smov 64   ;;  %s28_s13 = int_to_ptr.vmem [resolvable:$true] %s27_s13 }
   0x4   :  { %s707_s15 = smov 4  }
   0x5   :  { %33 = dma.hbm_to_vmem [thread:$0]  %s26_s11, 256, %s28_s13, [#allocation6], %s706_s14, %s706_s14, %s707_s15  }
   0x6   :  { %699 = dma.done.wait [#allocation6], 256  }
   0x7   :  { %700 = vsyncadd [#allocation6], 4294967040  ;;  %vm51_vm0 = vcmask 254976   ;;  %v708_v0 = vmov 0.0   ;;  %vm56_vm1 = vcmask 261120   ;;  %v579_v1 = vld [vmem:[#allocation5 + $0x8] sm:$0xff]  ;;  %v196_v40 = vlaneseq  ;;  %s502_s10 = scvt.s32.f32 %s943_s0 }
   0x8   :  { %52 = vst.msk [vmem:[#allocation2] sm:$0x3] %vm51_vm0, %v708_v0  ;;  %v54_v2 = vld [vmem:[%s944_s1] sm:$0xff]  ;;  %v55_v3 = vld [vmem:[%s944_s1 + $0x8] sm:$0xff]  ;;  %114 = vmatpush.bf16.msra.mxu0 %v579_v1  ;;  %vm73_vm2 = vcmask 1041409   ;;  %v709_v28 = vmov 0  }
   0x9   :  { %v57_v4 = vsel %vm56_vm1, %v54_v2, 0.0  ;;  %v581_v5 = vld [vmem:[%s947_s4 + $0x8] sm:$0xff]  ;;  %v64_v8 = vsel %vm56_vm1, %v55_v3, 0.0  ;;  %v580_v26 = vld [vmem:[%s947_s4] sm:$0xff]  ;;  %590 = vset.pattern.permute.xlu0 %v709_v28  ;;  %v197_v42 = vand.u32 127, %v196_v40  ;;  %vm172_vm5 = vcmask 25600  }
   0xa   :  { %v578_v6 = vld [vmem:[#allocation5] sm:$0xff]  ;;  %v58_v7 = vrot.slane %v57_v4, 4  ;;  %v65_v9 = vrot.slane %v64_v8, 4  ;;  %151 = vmatpush.bf16.msra.mxu1 %v581_v5  ;;  %v195_v27 = vld [vmem:[%s949_s6] sm:$0x3]  ;;  %s525_s27 = sshll.u32 %s950_s7, 4  ;;  %s526_s27 = int_to_ptr.hbm [resolvable:$true] %s525_s27 }
   0xb   :  { %199 = vperm.xlu0 %590, %v195_v27   ;;  %v591_v29 = vld [vmem:[%s946_s3] ss:$0 sm:$0xff]  ;;  %s710_s28 = smov [#allocation8]   ;;  %s711_s11 = smov 1.0  }
   0xc   :  { %v59_v10 = vadd.f32 %v58_v7, %v57_v4  ;;  %v66_v11 = vadd.f32 %v65_v9, %v64_v8  ;;  %115 = vmatpush.bf16.msra.mxu0 %v578_v6  ;;  %v592_v34 = vld [vmem:[%s948_s5] ss:$0 sm:$0xff]  ;;  %s523_s29 = sshll.u32 %s710_s28, 4  ;;  %s503_s12 = smin.f32 %s711_s11, %s502_s10  ;;  %s524_s29 = int_to_ptr.vmem [resolvable:$true] %s523_s29 }
   0xd   :  { %s712_s0 = smov [#allocation9]   ;;  %s538_s16 = sshll.u32 %s952_s9, 4  ;;  %s539_s16 = int_to_ptr.hbm [resolvable:$true] %s538_s16 }
   0xe   :  { %v60_v12 = vrot.slane %v59_v10, 2  ;;  %v67_v13 = vrot.slane %v66_v11, 2  ;;  %152 = vmatpush.bf16.msra.mxu1 %v580_v26  ;;  %s536_s13 = sshll.u32 %s712_s0, 4  ;;  %s537_s13 = int_to_ptr.vmem [resolvable:$true] %s536_s13 }
   0xf   :  { %v53_v19 = vld [vmem:[#allocation2] sm:$0x3] }
  0x10   :  { %v61_v14 = vadd.f32 %v60_v12, %v59_v10  ;;  %v68_v15 = vadd.f32 %v67_v13, %v66_v11 }
  0x12   :  { %v62_v16 = vrot.slane %v61_v14, 1  ;;  %v69_v17 = vrot.slane %v68_v15, 1 }
  0x14   :  { %v63_v18 = vadd.f32 %v62_v16, %v61_v14  ;;  %v70_v20 = vadd.f32 %v69_v17, %v68_v15 }
  0x16   :  { %v74_v21 = vsel %vm73_vm2, %v70_v20, %v63_v18 }
  0x17   :  { %v76_v22 = vadd.f32 %v74_v21, %v53_v19 }
  0x19   :  { %78 = vst.msk [vmem:[#allocation2] sm:$0x3] %vm51_vm0, %v76_v22  ;;  %vm193_vm0 = vcmask 1024  }
  0x20   :  { %v82_v23 = vld [vmem:[#allocation2] sm:$0x3] }
  0x21   :  { %v83_v24 = vmul.f32 0.125, %v82_v23 }
  0x23   :  { %v84_v25 = vpack.c.bf16 %v83_v24, %v83_v24 }
  0x25   :  { %563 = vmatmul.msk.bf16.vlgmr.msra.gmra.mxu0 %vm56_vm1, %v84_v25 }
  0x7d   :  { %v200_v43 = vpop.permute.xlu0 %199 }
  0x7e   :  { %vm201_vm3 = vcmp.eq.s32.totalorder %v197_v42, %v200_v43 }
  0x7f   :  { %v573_v47 = vsel %vm201_vm3, 1.0, %v708_v0 }
  0x80   :  { %v333_v50 = vsub.f32 1.0, %v573_v47 }
  0xa2   :  { %v117_v30 = vpop.f32.mrf.mxu0 }
  0xa3   :  { %v118_v31 = vadd.f32 %v591_v29, %v117_v30 }
  0xa5   :  { %v121_v32 = vpack.c.bf16 %v118_v31, %v118_v31 }
  0xa7   :  { %572 = vmatmul.msk.bf16.vlgmr.msra.gmra.mxu1 %vm56_vm1, %v121_v32 }
  0xaa   :  { %v119_v33 = vpop.f32.mrf.mxu0 }
 0x124   :  { %v154_v35 = vpop.f32.mrf.mxu1 }
 0x125   :  { %v155_v36 = vadd.f32 %v592_v34, %v154_v35 }
 0x127   :  { %v159_v37 = vmin.f32 %v155_v36, 20.0  ;;  %vm158_vm6 = vcmp.gt.f32.partialorder %v155_v36, 20.0 }
 0x129   :  { %v160_v38 = vmul.f32 1.442695, %v159_v37 }
 0x12b   :  { %593 = vpow2.f32 %v160_v38 }
 0x12c   :  { %v156_v39 = vpop.f32.mrf.mxu1 }
 0x131   :  { %v594_v41 = vpop.eup %593 }
 0x132   :  { %v162_v44 = vadd.f32 1.0, %v594_v41  ;;  %v165_v45 = vmul.f32 -0.5, %v594_v41  ;;  %v168_v48 = vand.u32 2147483647, %v594_v41 }
 0x134   :  { %595 = vlog2.f32 %v162_v44  ;;  %v166_v46 = vadd.f32 1.0, %v165_v45  ;;  %vm169_vm4 = vcmp.lt.f32.partialorder %v168_v48, 0.0004427343 }
 0x136   :  { %v167_v52 = vmul.f32 %v594_v41, %v166_v46 }
 0x13a   :  { %v596_v49 = vpop.eup %595 }
 0x13b   :  { %v164_v51 = vmul.f32 0.6931472, %v596_v49 }
 0x13d   :  { %v170_v53 = vsel %vm169_vm4, %v167_v52, %v164_v51 }
 0x13e   :  { %v171_v54 = vsel %vm158_vm6, %v155_v36, %v170_v53 }
 0x13f   :  { %v174_v55 = vadd.f32 1.0, %v171_v54  ;;  %v334_v56 = vmul.f32 %v333_v50, %v171_v54  ;;  %173 = vst.msk [vmem:[#allocation8] sm:$0x3] %vm172_vm5, %v171_v54 }
 0x140   :  { %528 = dma.vmem_to_hbm [thread:$0]  %s524_s29, 32, %s526_s27, [#allocation7]  }
 0x141   :  { %v175_v57 = vsel %vm172_vm5, %v174_v55, 0.0  ;;  %v795_v58 = vadd.f32 1.0, %v334_v56  ;;  %v204_v62 = vmul.f32 %v573_v47, %v174_v55 }
 0x142   :  { %176 = vadd.xlane.f32.xlu1 %v175_v57 }
 0x143   :  { %v336_v59 = vsel %vm172_vm5, %v795_v58, 0.0  ;;  %v381_v60 = vadd.f32 1.0, %v795_v58  ;;  %v801_v61 = vadd.f32 6.0, %v795_v58  ;;  %v383_v0 = vadd.f32 2.0, %v795_v58 }
 0x144   :  { %337 = vadd.xlane.f32.xlu0 %v336_v59  ;;  %v385_v3 = vadd.f32 3.0, %v795_v58  ;;  %v205_v5 = vsel %vm172_vm5, %v204_v62, 0.0  ;;  %v387_v7 = vadd.f32 4.0, %v795_v58  ;;  %v389_v10 = vadd.f32 5.0, %v795_v58 }
 0x145   :  { %v382_v63 = vmul.f32 %v381_v60, %v795_v58  ;;  %v428_v1 = vadd.f32 %v381_v60, %v795_v58  ;;  %597 = vrcp.f32 %v801_v61  ;;  %v405_v18 = vand.u32 2147483648, %v801_v61 }
 0x146   :  { %599 = vlog2.f32 %v801_v61  ;;  %v403_v21 = vand.u32 2147483647, %v801_v61  ;;  %vm399_vm8 = vweird.f32 %v801_v61  ;;  %v575_v31 = vadd.f32 -0.5, %v801_v61 }
 0x147   :  { %v384_v2 = vmul.f32 %v383_v0, %v382_v63  ;;  %v429_v4 = vmul.f32 %v428_v1, %v383_v0  ;;  %v406_v25 = vor.u32 1.1754944e-38, %v405_v18 }
 0x148   :  { %vm404_vm10 = vcmp.eq.f32.partialorder %v403_v21, 8.507059e+37 }
 0x149   :  { %v386_v6 = vmul.f32 %v385_v3, %v384_v2  ;;  %v430_v8 = vadd.f32 %v429_v4, %v382_v63 }
 0x14a   :  { %206 = vadd.xlane.f32.xlu1 %v205_v5 }
 0x14b   :  { %v388_v9 = vmul.f32 %v387_v7, %v386_v6  ;;  %v431_v11 = vmul.f32 %v430_v8, %v385_v3  ;;  %v598_v12 = vpop.eup %597 }
 0x14c   :  { %v395_v14 = vmul.f32 %v598_v12, %v801_v61  ;;  %v600_v19 = vpop.eup %599  ;;  %vm400_vm7 = vweird.f32 %v598_v12 }
 0x14d   :  { %v390_v13 = vmul.f32 %v389_v10, %v388_v9  ;;  %v432_v15 = vadd.f32 %v431_v11, %v384_v2  ;;  %vm401_vm9 = vmor %vm399_vm8, %vm400_vm7  ;;  %v417_v26 = vmul.f32 0.6931472, %v600_v19 }
 0x14e   :  { %v396_v16 = vsub.f32 1.0, %v395_v14 }
 0x14f   :  { %v433_v17 = vmul.f32 %v432_v15, %v387_v7  ;;  %601 = vrcp.f32 %v390_v13  ;;  %v418_v35 = vmul.f32 %v575_v31, %v417_v26  ;;  %v446_v40 = vand.u32 2147483647, %v390_v13 }
 0x150   :  { %v397_v20 = vmul.f32 %v598_v12, %v396_v16  ;;  %603 = vlog2.f32 %v390_v13  ;;  %v448_v41 = vand.u32 2147483648, %v390_v13  ;;  %vm442_vm12 = vweird.f32 %v390_v13 }
 0x151   :  { %v434_v22 = vadd.f32 %v433_v17, %v386_v6  ;;  %v419_v46 = vsub.f32 %v418_v35, %v801_v61  ;;  %vm447_vm14 = vcmp.eq.f32.partialorder %v446_v40, 8.507059e+37 }
 0x152   :  { %v398_v23 = vadd.f32 %v598_v12, %v397_v20  ;;  %v449_v49 = vor.u32 1.1754944e-38, %v448_v41 }
 0x153   :  { %v435_v24 = vmul.f32 %v434_v22, %v389_v10  ;;  %v420_v56 = vadd.f32 0.9189385, %v419_v46 }
 0x154   :  { %v402_v27 = vsel %vm401_vm9, %v598_v12, %v398_v23 }
 0x155   :  { %v436_v28 = vadd.f32 %v435_v24, %v388_v9  ;;  %v602_v29 = vpop.eup %601  ;;  %v407_v30 = vsel %vm404_vm10, %v406_v25, %v402_v27 }
 0x156   :  { %v409_v32 = vmul.f32 %v407_v30, %v407_v30  ;;  %v457_v33 = vmul.f32 0.5, %v407_v30  ;;  %v438_v34 = vmul.f32 %v602_v29, %v390_v13  ;;  %vm443_vm11 = vweird.f32 %v602_v29  ;;  %v604_v53 = vpop.eup %603 }
 0x157   :  { %vm444_vm13 = vmor %vm442_vm12, %vm443_vm11  ;;  %v392_v60 = vmul.f32 0.6931472, %v604_v53 }
 0x158   :  { %v410_v36 = vmul.f32 0.0007936508, %v409_v32  ;;  %v439_v37 = vsub.f32 1.0, %v438_v34  ;;  %v452_v38 = vmul.f32 0.003968254, %v409_v32  ;;  %v458_v39 = vsub.f32 %v417_v26, %v457_v33 }
 0x15a   :  { %v411_v42 = vsub.f32 0.0027777778, %v410_v36  ;;  %v440_v43 = vmul.f32 %v602_v29, %v439_v37  ;;  %v453_v44 = vsub.f32 0.008333334, %v452_v38 }
 0x15c   :  { %v412_v45 = vmul.f32 %v411_v42, %v409_v32  ;;  %v441_v47 = vadd.f32 %v602_v29, %v440_v43  ;;  %v454_v48 = vmul.f32 %v453_v44, %v409_v32 }
 0x15e   :  { %v413_v50 = vsub.f32 0.083333336, %v412_v45  ;;  %v445_v51 = vsel %vm444_vm13, %v602_v29, %v441_v47  ;;  %v455_v52 = vsub.f32 0.083333336, %v454_v48 }
 0x15f   :  { %v450_v54 = vsel %vm447_vm14, %v449_v49, %v445_v51 }
 0x160   :  { %v414_v55 = vmul.f32 %v413_v50, %v407_v30  ;;  %v818_v57 = vmul.f32 %v450_v54, %v436_v28  ;;  %v456_v59 = vmul.f32 %v455_v52, %v409_v32 }
 0x162   :  { %v421_v62 = vadd.f32 %v420_v56, %v414_v55  ;;  %v820_v63 = vsub.f32 %v458_v39, %v456_v59 }
 0x164   :  { %v422_v61 = vsub.f32 %v421_v62, %v392_v60  ;;  %v460_v0 = vsub.f32 %v820_v63, %v818_v57 }
 0x166   :  { %v423_v1 = vsel %vm172_vm5, %v422_v61, 0.0 }
 0x167   :  { %424 = vadd.xlane.f32.xlu2 %v423_v1 }
 0x1b5   :  { %v825_v2 = vpop.xlane.xlu1 %176 }
 0x1b6   :  { %605 = vrcp.f32 %v825_v2  ;;  %v187_v18 = vand.u32 2147483647, %v825_v2  ;;  %v189_v19 = vand.u32 2147483648, %v825_v2  ;;  %vm183_vm1 = vweird.f32 %v825_v2 }
 0x1b7   :  { %v338_v3 = vpop.xlane.xlu0 %337  ;;  %v208_v63 = vadd.f32 1.0, %v825_v2 }
 0x1b8   :  { %v339_v4 = vadd.f32 1.0, %v338_v3  ;;  %v828_v5 = vadd.f32 6.0, %v338_v3  ;;  %v341_v7 = vadd.f32 2.0, %v338_v3  ;;  %v343_v11 = vadd.f32 3.0, %v338_v3 }
 0x1b9   :  { %v345_v15 = vadd.f32 4.0, %v338_v3  ;;  %v347_v21 = vadd.f32 5.0, %v338_v3  ;;  %vm188_vm3 = vcmp.eq.f32.partialorder %v187_v18, 8.507059e+37  ;;  %v190_v31 = vor.u32 1.1754944e-38, %v189_v19 }
 0x1ba   :  { %v340_v6 = vmul.f32 %v339_v4, %v338_v3  ;;  %v461_v8 = vadd.f32 %v339_v4, %v338_v3  ;;  %607 = vrcp.f32 %v828_v5  ;;  %v574_v29 = vadd.f32 -0.5, %v828_v5 }
 0x1bb   :  { %609 = vlog2.f32 %v828_v5  ;;  %v361_v34 = vand.u32 2147483647, %v828_v5  ;;  %v363_v35 = vand.u32 2147483648, %v828_v5  ;;  %vm357_vm6 = vweird.f32 %v828_v5 }
 0x1bc   :  { %v606_v9 = vpop.eup %605  ;;  %v342_v10 = vmul.f32 %v341_v7, %v340_v6  ;;  %v462_v12 = vmul.f32 %v461_v8, %v341_v7 }
 0x1bd   :  { %v179_v13 = vmul.f32 %v606_v9, %v825_v2  ;;  %vm184_vm15 = vweird.f32 %v606_v9  ;;  %v364_v43 = vor.u32 1.1754944e-38, %v363_v35  ;;  %vm362_vm8 = vcmp.eq.f32.partialorder %v361_v34, 8.507059e+37 }
 0x1be   :  { %v344_v14 = vmul.f32 %v343_v11, %v342_v10  ;;  %v463_v16 = vadd.f32 %v462_v12, %v340_v6  ;;  %vm185_vm2 = vmor %vm183_vm1, %vm184_vm15  ;;  %v211_v34 = vadd.f32 2.0, %v825_v2 }
 0x1bf   :  { %v180_v17 = vsub.f32 1.0, %v179_v13 }
 0x1c0   :  { %v835_v20 = vmul.f32 %v345_v15, %v344_v14  ;;  %v608_v22 = vpop.eup %607  ;;  %v464_v26 = vmul.f32 %v463_v16, %v343_v11 }
 0x1c1   :  { %v181_v23 = vmul.f32 %v606_v9, %v180_v17  ;;  %v610_v24 = vpop.eup %609  ;;  %v353_v27 = vmul.f32 %v608_v22, %v828_v5  ;;  %vm358_vm4 = vweird.f32 %v608_v22 }
 0x1c2   :  { %v348_v25 = vmul.f32 %v347_v21, %v835_v20  ;;  %v375_v30 = vmul.f32 0.6931472, %v610_v24  ;;  %v465_v39 = vadd.f32 %v464_v26, %v342_v10  ;;  %vm359_vm7 = vmor %vm357_vm6, %vm358_vm4  ;;  %v207_v26 = vpop.xlane.xlu1 %206 }
 0x1c3   :  { %v182_v28 = vadd.f32 %v606_v9, %v181_v23  ;;  %v354_v32 = vsub.f32 1.0, %v353_v27  ;;  %v576_v23 = vadd.f32 -1.0, %v795_v58  ;;  %v864_v27 = vadd.f32 6.0, %v207_v26 }
 0x1c4   :  { %611 = vrcp.f32 %v348_v25  ;;  %v376_v36 = vmul.f32 %v574_v29, %v375_v30  ;;  %v466_v46 = vmul.f32 %v465_v39, %v345_v15  ;;  %v481_v55 = vand.u32 2147483648, %v348_v25 }
 0x1c5   :  { %v186_v33 = vsel %vm185_vm2, %v606_v9, %v182_v28  ;;  %v355_v38 = vmul.f32 %v608_v22, %v354_v32  ;;  %613 = vlog2.f32 %v348_v25  ;;  %v479_v59 = vand.u32 2147483647, %v348_v25 }
 0x1c6   :  { %v191_v37 = vsel %vm188_vm3, %v190_v31, %v186_v33  ;;  %v377_v41 = vsub.f32 %v376_v36, %v828_v5  ;;  %v467_v52 = vadd.f32 %v466_v46, %v344_v14  ;;  %vm475_vm10 = vweird.f32 %v348_v25 }
 0x1c7   :  { %v192_v40 = vmul.f32 4.0, %v191_v37  ;;  %v356_v42 = vadd.f32 %v608_v22, %v355_v38  ;;  %v482_v6 = vor.u32 1.1754944e-38, %v481_v55  ;;  %vm480_vm12 = vcmp.eq.f32.partialorder %v479_v59, 8.507059e+37 }
 0x1c8   :  { %v468_v3 = vmul.f32 %v467_v52, %v347_v21  ;;  %v378_v10 = vadd.f32 0.9189385, %v377_v41  ;;  %v867_v58 = vadd.f32 6.0, %v825_v2  ;;  %615 = vrcp.f32 %v864_v27 }
 0x1c9   :  { %194 = vst.msk [vmem:[%s951_s8] sm:$0x3] %vm193_vm0, %v192_v40  ;;  %v360_v45 = vsel %vm359_vm7, %v608_v22, %v356_v42  ;;  %v270_v57 = vadd.f32 1.0, %v207_v26  ;;  %v210_v31 = vmul.f32 %v208_v63, %v825_v2  ;;  %v277_v36 = vadd.f32 3.0, %v207_v26 }
 0x1ca   :  { %v612_v44 = vpop.eup %611  ;;  %v365_v47 = vsel %vm362_vm8, %v364_v43, %v360_v45  ;;  %v469_v13 = vadd.f32 %v468_v3, %v835_v20  ;;  %617 = vrcp.f32 %v867_v58  ;;  %v215_v39 = vadd.f32 3.0, %v825_v2 }
 0x1cb   :  { %v471_v48 = vmul.f32 %v612_v44, %v348_v25  ;;  %v367_v49 = vmul.f32 %v365_v47, %v365_v47  ;;  %vm476_vm9 = vweird.f32 %v612_v44  ;;  %v490_v1 = vmul.f32 0.5, %v365_v47  ;;  %v614_v9 = vpop.eup %613 }
 0x1cc   :  { %vm477_vm11 = vmor %vm475_vm10, %vm476_vm9  ;;  %v850_v16 = vmul.f32 0.6931472, %v614_v9  ;;  %v272_v28 = vmul.f32 %v270_v57, %v207_v26  ;;  %v214_v37 = vmul.f32 %v211_v34, %v210_v31  ;;  %v281_v42 = vadd.f32 4.0, %v207_v26 }
 0x1cd   :  { %v472_v50 = vsub.f32 1.0, %v471_v48  ;;  %v368_v51 = vmul.f32 0.0007936508, %v367_v49  ;;  %v485_v53 = vmul.f32 0.003968254, %v367_v49  ;;  %v491_v15 = vsub.f32 %v375_v30, %v490_v1 }
 0x1ce   :  { %v273_v30 = vadd.f32 2.0, %v207_v26  ;;  %v879_v43 = vmul.f32 %v215_v39, %v214_v37  ;;  %v219_v45 = vadd.f32 4.0, %v825_v2  ;;  %v885_v48 = vadd.f32 5.0, %v207_v26 }
 0x1cf   :  { %v473_v54 = vmul.f32 %v612_v44, %v472_v50  ;;  %v369_v56 = vsub.f32 0.0027777778, %v368_v51  ;;  %v486_v60 = vsub.f32 0.008333334, %v485_v53  ;;  %v271_v51 = vadd.f32 %v270_v57, %v207_v26 }
 0x1d0   :  { %v276_v33 = vmul.f32 %v273_v30, %v272_v28  ;;  %v891_v52 = vadd.f32 5.0, %v825_v2  ;;  %vm310_vm14 = vweird.f32 %v864_v27  ;;  %v209_v59 = vadd.f32 %v208_v63, %v825_v2 }
 0x1d1   :  { %v474_v62 = vadd.f32 %v612_v44, %v473_v54  ;;  %v370_v61 = vmul.f32 %v369_v56, %v367_v49  ;;  %v487_v4 = vmul.f32 %v486_v60, %v367_v49  ;;  %v316_v54 = vand.u32 2147483648, %v864_v27 }
 0x1d2   :  { %v877_v40 = vmul.f32 %v277_v36, %v276_v33  ;;  %v314_v56 = vand.u32 2147483647, %v864_v27  ;;  %vm248_vm0 = vweird.f32 %v867_v58  ;;  %v274_v3 = vmul.f32 %v273_v30, %v271_v51 }
 0x1d3   :  { %v478_v5 = vsel %vm477_vm11, %v612_v44, %v474_v62  ;;  %v371_v7 = vsub.f32 0.083333336, %v370_v61  ;;  %v488_v8 = vsub.f32 0.083333336, %v487_v4  ;;  %v254_v62 = vand.u32 2147483648, %v867_v58 }
 0x1d4   :  { %v483_v11 = vsel %vm480_vm12, %v482_v6, %v478_v5  ;;  %v883_v46 = vmul.f32 %v281_v42, %v877_v40  ;;  %v252_v61 = vand.u32 2147483647, %v867_v58  ;;  %v317_v4 = vor.u32 1.1754944e-38, %v316_v54 }
 0x1d5   :  { %v372_v12 = vmul.f32 %v371_v7, %v365_v47  ;;  %v489_v14 = vmul.f32 %v488_v8, %v367_v49  ;;  %v484_v18 = vmul.f32 %v483_v11, %v469_v13  ;;  %v888_v49 = vmul.f32 %v219_v45, %v879_v43 }
 0x1d6   :  { %v895_v53 = vmul.f32 %v885_v48, %v883_v46  ;;  %vm315_vm2 = vcmp.eq.f32.partialorder %v314_v56, 8.507059e+37  ;;  %v212_v2 = vmul.f32 %v211_v34, %v209_v59  ;;  %v255_v6 = vor.u32 1.1754944e-38, %v254_v62 }
 0x1d7   :  { %v852_v17 = vadd.f32 %v378_v10, %v372_v12  ;;  %v492_v19 = vsub.f32 %v491_v15, %v489_v14  ;;  %v903_v60 = vmul.f32 %v891_v52, %v888_v49  ;;  %vm253_vm3 = vcmp.eq.f32.partialorder %v252_v61, 8.507059e+37 }
 0x1d8   :  { %619 = vrcp.f32 %v895_v53  ;;  %v275_v8 = vadd.f32 %v274_v3, %v272_v28  ;;  %v213_v12 = vadd.f32 %v212_v2, %v210_v31  ;;  %vm294_vm7 = vweird.f32 %v895_v53 }
 0x1d9   :  { %v380_v21 = vsub.f32 %v852_v17, %v850_v16  ;;  %v493_v22 = vsub.f32 %v492_v19, %v484_v18  ;;  %621 = vrcp.f32 %v903_v60  ;;  %vm232_vm8 = vweird.f32 %v903_v60 }
 0x1da   :  { %v278_v15 = vmul.f32 %v277_v36, %v275_v8  ;;  %623 = vlog2.f32 %v864_v27 }
 0x1db   :  { %v494_v24 = vsub.f32 %v460_v0, %v493_v22  ;;  %v616_v0 = vpop.eup %615  ;;  %v216_v22 = vmul.f32 %v215_v39, %v213_v12  ;;  %625 = vlog2.f32 %v867_v58 }
 0x1dc   :  { %v618_v29 = vpop.eup %617  ;;  %v306_v32 = vmul.f32 %v616_v0, %v864_v27  ;;  %v300_v27 = vand.u32 2147483648, %v895_v53 }
 0x1dd   :  { %v495_v25 = vmul.f32 %v576_v23, %v494_v24  ;;  %v244_v35 = vmul.f32 %v618_v29, %v867_v58  ;;  %vm249_vm13 = vweird.f32 %v618_v29  ;;  %v217_v57 = vadd.f32 %v216_v22, %v214_v37 }
 0x1de   :  { %v307_v38 = vsub.f32 1.0, %v306_v32  ;;  %vm250_vm1 = vmor %vm248_vm0, %vm249_vm13  ;;  %v620_v11 = vpop.eup %619  ;;  %v301_v62 = vor.u32 1.1754944e-38, %v300_v27  ;;  %vm516_vm13 = vcmask 0  }
 0x1df   :  { %v496_v20 = vsel %vm172_vm5, %v495_v25, 0.0  ;;  %v245_v41 = vsub.f32 1.0, %v244_v35  ;;  %vm311_vm5 = vweird.f32 %v616_v0  ;;  %v622_v14 = vpop.eup %621  ;;  %v290_v18 = vmul.f32 %v620_v11, %v895_v53 }
 0x1e0   :  { %497 = vadd.xlane.f32.xlu2 %v496_v20  ;;  %v308_v44 = vmul.f32 %v616_v0, %v307_v38  ;;  %vm312_vm15 = vmor %vm310_vm14, %vm311_vm5  ;;  %v228_v23 = vmul.f32 %v622_v14, %v903_v60  ;;  %v279_v25 = vadd.f32 %v278_v15, %v276_v33  ;;  %v220_v31 = vmul.f32 %v219_v45, %v217_v57  ;;  %v624_v38 = vpop.eup %623  ;;  %v425_v45 = vpop.xlane.xlu2 %424 }
 0x1e1   :  { %v246_v47 = vmul.f32 %v618_v29, %v245_v41  ;;  %v291_v20 = vsub.f32 1.0, %v290_v18  ;;  %vm295_vm4 = vweird.f32 %v620_v11  ;;  %vm233_vm6 = vweird.f32 %v622_v14  ;;  %v626_v39 = vpop.eup %625 }
 0x1e2   :  { %v309_v50 = vadd.f32 %v616_v0, %v308_v44  ;;  %v229_v63 = vsub.f32 1.0, %v228_v23  ;;  %v282_v28 = vmul.f32 %v281_v42, %v279_v25  ;;  %v221_v37 = vadd.f32 %v220_v31, %v879_v43  ;;  %vm924_vm9 = vmor %vm294_vm7, %vm295_vm4 }
 0x1e3   :  { %v247_v55 = vadd.f32 %v618_v29, %v246_v47  ;;  %v298_v42 = vand.u32 2147483647, %v895_v53  ;;  %v238_v47 = vand.u32 2147483648, %v903_v60  ;;  %vm234_vm10 = vmor %vm232_vm8, %vm233_vm6  ;;  %v265_v59 = vmul.f32 0.6931472, %v626_v39 }
 0x1e4   :  { %v313_v1 = vsel %vm312_vm15, %v616_v0, %v309_v50  ;;  %v230_v32 = vmul.f32 %v622_v14, %v229_v63  ;;  %v283_v35 = vadd.f32 %v282_v28, %v877_v40  ;;  %v236_v40 = vand.u32 2147483647, %v903_v60 }
 0x1e5   :  { %v251_v5 = vsel %vm250_vm1, %v618_v29, %v247_v55  ;;  %v318_v7 = vsel %vm315_vm2, %v317_v4, %v313_v1  ;;  %v292_v29 = vmul.f32 %v620_v11, %v291_v20  ;;  %v327_v55 = vmul.f32 0.6931472, %v624_v38 }
 0x1e6   :  { %v256_v9 = vsel %vm253_vm3, %v255_v6, %v251_v5  ;;  %v320_v10 = vmul.f32 %v318_v7, %v318_v7  ;;  %v231_v58 = vadd.f32 %v622_v14, %v230_v32  ;;  %v328_v44 = vmul.f32 0.5, %v318_v7 }
 0x1e7   :  { %v258_v13 = vmul.f32 %v256_v9, %v256_v9  ;;  %v293_v36 = vadd.f32 %v620_v11, %v292_v29  ;;  %v286_v43 = vmul.f32 %v885_v48, %v283_v35  ;;  %v266_v51 = vmul.f32 0.5, %v256_v9 }
 0x1e8   :  { %v321_v19 = vmul.f32 0.003968254, %v320_v10  ;;  %v224_v56 = vmul.f32 %v891_v52, %v221_v37  ;;  %v235_v48 = vsel %vm234_vm10, %v622_v14, %v231_v58  ;;  %vm299_vm11 = vcmp.eq.f32.partialorder %v298_v42, 8.507059e+37 }
 0x1e9   :  { %v259_v24 = vmul.f32 0.003968254, %v258_v13  ;;  %v297_v54 = vsel %vm924_vm9, %v620_v11, %v293_v36  ;;  %v329_v61 = vsub.f32 %v327_v55, %v328_v44  ;;  %v239_v1 = vor.u32 1.1754944e-38, %v238_v47 }
 0x1ea   :  { %v322_v26 = vsub.f32 0.008333334, %v321_v19  ;;  %v302_v3 = vsel %vm299_vm11, %v301_v62, %v297_v54  ;;  %vm237_vm12 = vcmp.eq.f32.partialorder %v236_v40, 8.507059e+37  ;;  %v267_v4 = vsub.f32 %v265_v59, %v266_v51 }
 0x1eb   :  { %v260_v0 = vsub.f32 0.008333334, %v259_v24  ;;  %v287_v5 = vadd.f32 %v286_v43, %v883_v46  ;;  %v240_v52 = vsel %vm237_vm12, %v239_v1, %v235_v48  ;;  %v426_v6 = vsub.f32 %v380_v21, %v425_v45 }
 0x1ec   :  { %v323_v30 = vmul.f32 %v322_v26, %v320_v10  ;;  %v225_v7 = vadd.f32 %v224_v56, %v888_v49  ;;  %v504_v14 = vstv %s503_s12  ;;  %vm507_vm5 = vcmask 1041408  }
 0x1ed   :  { %v261_v34 = vmul.f32 %v260_v0, %v258_v13  ;;  %v303_v9 = vmul.f32 %v302_v3, %v287_v5 }
 0x1ee   :  { %v324_v33 = vsub.f32 0.083333336, %v323_v30  ;;  %v241_v11 = vmul.f32 %v240_v52, %v225_v7 }
 0x1ef   :  { %v262_v41 = vsub.f32 0.083333336, %v261_v34 }
 0x1f0   :  { %v325_v53 = vmul.f32 %v324_v33, %v320_v10 }
 0x1f1   :  { %v263_v60 = vmul.f32 %v262_v41, %v258_v13 }
 0x1f2   :  { %v330_v2 = vsub.f32 %v329_v61, %v325_v53 }
 0x1f3   :  { %v268_v8 = vsub.f32 %v267_v4, %v263_v60 }
 0x1f4   :  { %v331_v12 = vsub.f32 %v330_v2, %v303_v9 }
 0x1f5   :  { %v269_v15 = vsub.f32 %v268_v8, %v241_v11 }
 0x1f7   :  { %v332_v46 = vsub.f32 %v269_v15, %v331_v12 }
 0x253   :  { %v498_v10 = vpop.xlane.xlu2 %497 }
 0x254   :  { %v499_v13 = vadd.f32 %v498_v10, %v426_v6 }
 0x256   :  { %v577_v18 = vadd.f32 -1.7917595, %v499_v13 }
 0x258   :  { %v505_v19 = vmul.f32 %v577_v18, %v504_v14 }
 0x25a   :  { %v506_v22 = vadd.f32 %v505_v19, %v332_v46 }
 0x25c   :  { %v508_v23 = vsel %vm507_vm5, %v506_v22, 0.0 }
 0x25d   :  { %v509_v16 = vrot.slane %v508_v23, 4 }
 0x25f   :  { %v510_v17 = vadd.f32 %v509_v16, %v508_v23 }
 0x261   :  { %v511_v21 = vrot.slane %v510_v17, 2 }
 0x263   :  { %v512_v24 = vadd.f32 %v511_v21, %v510_v17 }
 0x265   :  { %v513_v25 = vrot.slane %v512_v24, 1 }
 0x267   :  { %v514_v49 = vadd.f32 %v513_v25, %v512_v24 }
 0x269   :  { %v515_v20 = vmul.f32 0.5, %v514_v49 }
 0x26b   :  { %517 = vst.msk [vmem:[#allocation9] sm:$0x1] %vm516_vm13, %v515_v20 }
 0x26c   :  { %541 = dma.vmem_to_hbm [thread:$0]  %s537_s13, 16, %s539_s16, [#allocation10]  }
 0x26d   :  { %701 = dma.done.wait [#allocation7], 32  }
 0x26e   :  { %702 = vsyncadd [#allocation7], 4294967264 }
 0x26f   :  { %703 = dma.done.wait [#allocation10], 16  }
 0x270   :  { %704 = vsyncadd [#allocation10], 4294967280 }
 0x271   :  { %552 = vsyncpa [#allocation6], 1 }
 0x272   :  { %553 = vsyncpa [#allocation7], 1 }
 0x273   :  { %554 = vsyncpa [#allocation10], 1 }

</bundles_post_ra>
